<compile_context>
chip_gen: v7x
topology: tpu7x:2x2x1
jax: 0.10.0
libtpu: 0.0.40
codegen_flags: <defaults>
</compile_context>

<pallas_src>
import functools

import jax
import jax.numpy as jnp
from jax.experimental import pallas as pl
from jax.experimental.pallas import tpu as pltpu


# ----------------------------------------------------------------------------
# helpers
# ----------------------------------------------------------------------------
def _round_up(x, m):
    return (x + m - 1) // m * m


def _vmem_budget():
    # Safe scoped-VMEM ceiling: ~45% of physical capacity (v7x has only 64 MiB).
    try:
        info = pltpu.get_tpu_info()
        cap = int(getattr(info, "vmem_capacity_bytes", 128 * 1024 * 1024))
    except Exception:
        cap = 128 * 1024 * 1024
    return int(0.45 * cap)


def adopt_weight(weight, global_step, threshold=0, value=0.0):
    # works for both python ints and traced global_step
    return jnp.where(global_step < threshold, value, weight)


def _pick_tile_m(m):
    """Pick an M tile that divides M exactly when possible (avoid pad/slice)."""
    if m >= 256:
        for t in (256, 128):
            if m % t == 0:
                return t, m
        return 256, _round_up(m, 256)
    for t in (128, 64, 32, 16):
        if m % t == 0:
            return t, m
    tm = _round_up(m, 16)
    return tm, tm


# ----------------------------------------------------------------------------
# Pallas kernel 1: bf16 matmul with VMEM-resident weights, fused bias
#                  (+ optional LeakyReLU) epilogue and optional per-channel
#                  sum / sum-of-squares output for BatchNorm statistics.
#   grid = (M tiles,)  -- fully "parallel", single K step.
# ----------------------------------------------------------------------------
def _matmul_bias_act_stats_kernel(a_ref, b_ref, shift_ref, o_ref, stats_ref,
                                  *, apply_act, neg_slope, emit_stats):
    out = jnp.dot(a_ref[...], b_ref[...], preferred_element_type=jnp.float32)
    out = out + shift_ref[...]
    if apply_act:
        out = jnp.where(out >= 0, out, neg_slope * out)
    o_ref[...] = out
    if emit_stats:
        srow = jnp.sum(out, axis=0, keepdims=True)           # (1, N)
        sqrow = jnp.sum(out * out, axis=0, keepdims=True)    # (1, N)
        rid = jax.lax.broadcasted_iota(jnp.int32, stats_ref.shape, 0)
        stats_ref[...] = jnp.where(rid == 0, srow,
                                   jnp.where(rid == 1, sqrow, 0.0))
    else:
        stats_ref[...] = jnp.zeros_like(stats_ref)


def matmul_bias_act_pallas(a, b, bias, apply_act, emit_stats, neg_slope=0.2):
    """a:(M,K), b:(K,N), bias:(N,)|None -> f32 (M,N) = act(a@b + bias).

    If emit_stats, also returns per-column (sum, sum_of_squares) over the M
    real rows (zero-padded rows contribute exactly 0 because bias is None on
    the stats path)."""
    m, k = a.shape
    _, n = b.shape

    tm, mp = _pick_tile_m(m)
    np_ = _round_up(n, 128)
    kp = _round_up(k, 128)
    tiles = mp // tm

    a_bf = a.astype(jnp.bfloat16)
    if (mp, kp) != (m, k):
        a_bf = jnp.pad(a_bf, ((0, mp - m), (0, kp - k)))
    b_bf = b.astype(jnp.bfloat16)
    if (kp, np_) != (k, n):
        b_bf = jnp.pad(b_bf, ((0, kp - k), (0, np_ - n)))
    shift = (bias.astype(jnp.float32) if bias is not None
             else jnp.zeros((n,), jnp.float32))
    shift_p = jnp.pad(shift, (0, np_ - n)).reshape(1, np_)

    # VMEM footprint: double-buffered A / out / stats, resident B, bias vector.
    footprint = (2 * tm * kp * 2 + 2 * kp * np_ * 2 + 2 * np_ * 4
                 + 2 * tm * np_ * 4 + 2 * 8 * np_ * 4)
    budget = _vmem_budget()
    vmem_limit = min(max(2 * footprint, 16 << 20), budget)
    vmem_limit = int(max(vmem_limit, footprint + (2 << 20)))

    kernel = functools.partial(_matmul_bias_act_stats_kernel,
                               apply_act=apply_act, neg_slope=neg_slope,
                               emit_stats=emit_stats)
    out, stats = pl.pallas_call(
        kernel,
        out_shape=(jax.ShapeDtypeStruct((mp, np_), jnp.float32),
                   jax.ShapeDtypeStruct((tiles * 8, np_), jnp.float32)),
        grid_spec=pltpu.PrefetchScalarGridSpec(
            num_scalar_prefetch=0,
            grid=(tiles,),
            in_specs=[
                pl.BlockSpec((tm, kp), lambda i: (i, 0)),
                pl.BlockSpec((kp, np_), lambda i: (0, 0)),   # VMEM-resident B
                pl.BlockSpec((1, np_), lambda i: (0, 0)),
            ],
            out_specs=[
                pl.BlockSpec((tm, np_), lambda i: (i, 0)),
                pl.BlockSpec((8, np_), lambda i: (i, 0)),
            ],
        ),
        compiler_params=pltpu.CompilerParams(
            dimension_semantics=("parallel",),
            vmem_limit_bytes=vmem_limit),
        cost_estimate=pl.CostEstimate(
            flops=2 * mp * np_ * kp,
            transcendentals=0,
            bytes_accessed=mp * kp * 2 + kp * np_ * 2 + mp * np_ * 4),
    )(a_bf, b_bf, shift_p)

    y = out if (mp == m and np_ == n) else out[:m, :n]
    if not emit_stats:
        return y, None
    s = stats.reshape(tiles, 8, np_).sum(axis=0)
    return y, (s[0, :n], s[1, :n])


# ----------------------------------------------------------------------------
# Pallas kernels 2/3: tiled scalar-sum reductions (|a-b| sum, KL sum).
#   grid = (2 "parallel" partitions, steps "arbitrary").  Each step does pure
#   VPU elementwise accumulation into a block-shaped f32 scratch; the
#   cross-lane/sublane reduce happens once, on the last step of each partition.
# ----------------------------------------------------------------------------
def _abs_diff_sum_kernel(a_ref, b_ref, o_ref, acc_ref):
    i = pl.program_id(1)

    @pl.when(i == 0)
    def _():
        acc_ref[...] = jnp.zeros_like(acc_ref)

    acc_ref[...] += jnp.abs(a_ref[...] - b_ref[...])

    @pl.when(i == pl.num_programs(1) - 1)
    def _():
        o_ref[...] = jnp.zeros_like(o_ref) + jnp.sum(acc_ref[...])


def _kl_sum_kernel(mu_ref, lv_ref, o_ref, acc_ref):
    i = pl.program_id(1)

    @pl.when(i == 0)
    def _():
        acc_ref[...] = jnp.zeros_like(acc_ref)

    mu = mu_ref[...]
    lv = lv_ref[...]
    # zero padding contributes 0.5*(0 + exp(0) - 1 - 0) = 0 exactly
    acc_ref[...] += 0.5 * (mu * mu + jnp.exp(lv) - 1.0 - lv)

    @pl.when(i == pl.num_programs(1) - 1)
    def _():
        o_ref[...] = jnp.zeros_like(o_ref) + jnp.sum(acc_ref[...])


def _tiled_sum_reduce(kernel, arrays):
    lanes = 512
    parts = 2                                  # both TensorCores on v7x
    n = arrays[0].size
    rows = -(-n // lanes)
    rows_pp = -(-rows // parts)
    tr = 256 if rows_pp >= 256 else _round_up(max(rows_pp, 1), 8)
    steps = -(-rows_pp // tr)
    rows_p = parts * steps * tr

    mats = []
    for a in arrays:
        flat = a.reshape(-1).astype(jnp.float32)
        flat = jnp.pad(flat, (0, rows_p * lanes - n))
        mats.append(flat.reshape(rows_p, lanes))

    out = pl.pallas_call(
        kernel,
        out_shape=jax.ShapeDtypeStruct((parts * 8, 128), jnp.float32),
        grid_spec=pltpu.PrefetchScalarGridSpec(
            num_scalar_prefetch=0,
            grid=(parts, steps),
            in_specs=[pl.BlockSpec((tr, lanes),
                                   lambda p, i: (p * steps + i, 0))
                      for _ in mats],
            out_specs=pl.BlockSpec((8, 128), lambda p, i: (p, 0)),
            scratch_shapes=[pltpu.VMEM((tr, lanes), jnp.float32)],
        ),
        compiler_params=pltpu.CompilerParams(
            dimension_semantics=("parallel", "arbitrary")),
    )(*mats)
    return out[0, 0] + out[8, 0]


def abs_diff_sum_pallas(a, b):
    return _tiled_sum_reduce(_abs_diff_sum_kernel, [a, b])


def kl_sum_pallas(mean, logvar):
    return _tiled_sum_reduce(_kl_sum_kernel, [mean, logvar])


# ----------------------------------------------------------------------------
# Conv2d (k=4, pad=1) via bf16 channel-last im2col + Pallas matmul epilogue.
#   x is NHWC; returns NHWC (plus BN batch stats when requested).
#   K ordering is (kh, kw, Cin) with Cin fastest; the PyTorch weight
#   (Cout, Cin, kh, kw) is flattened with the matching permutation.
# ----------------------------------------------------------------------------
def conv2d_pallas(x, w, bias, stride, apply_act, emit_stats=False):
    # TODO(synk): move the patch extraction into the Pallas kernel (strided
    # window BlockSpecs) to avoid materializing the im2col tensor at all.
    n, h, wdim, c = x.shape
    cout = w.shape[0]
    kk = 4
    xb = x.astype(jnp.bfloat16)                         # bf16 BEFORE im2col
    xp = jnp.pad(xb, ((0, 0), (1, 1), (1, 1), (0, 0)))
    ho = (h + 2 - kk) // stride + 1
    wo = (wdim + 2 - kk) // stride + 1

    taps = []
    for kh in range(kk):
        for kw in range(kk):
            taps.append(xp[:,
                           kh:kh + stride * (ho - 1) + 1:stride,
                           kw:kw + stride * (wo - 1) + 1:stride, :])
    p = jnp.stack(taps, axis=3)                         # (N, Ho, Wo, 16, C) bf16
    a = p.reshape(n * ho * wo, kk * kk * c)             # (M, K), C fastest
    bmat = jnp.transpose(w, (2, 3, 1, 0)).reshape(kk * kk * c, cout)

    y, stats = matmul_bias_act_pallas(a, bmat, bias, apply_act, emit_stats)
    y = y.reshape(n, ho, wo, cout)
    if not emit_stats:
        return y
    m_real = n * ho * wo
    ssum, ssq = stats
    mean = ssum / m_real
    var = ssq / m_real - mean * mean                    # biased var (training BN)
    return y, mean, var


def batchnorm_leaky(x, mean, var, gamma, beta, eps=1e-5, slope=0.2):
    # BatchNorm2d training-mode normalize (+LeakyReLU) using the batch stats
    # emitted by the conv kernel; XLA fuses this with the next im2col pass.
    y = (x - mean) * jax.lax.rsqrt(var + eps) * gamma + beta
    return jnp.where(y >= 0, y, slope * y)


# ----------------------------------------------------------------------------
# NLayerDiscriminator (input_nc=3, ndf=64, n_layers=3, BatchNorm2d)
# ----------------------------------------------------------------------------
def discriminator_forward(params, x_nchw):
    x = jnp.transpose(x_nchw, (0, 2, 3, 1))                       # NHWC
    h = conv2d_pallas(x, params["w0"], params["b0"], stride=2, apply_act=True)
    h, m1, v1 = conv2d_pallas(h, params["w1"], None, stride=2,
                              apply_act=False, emit_stats=True)
    h = batchnorm_leaky(h, m1, v1, params["g1"], params["be1"])
    h, m2, v2 = conv2d_pallas(h, params["w2"], None, stride=2,
                              apply_act=False, emit_stats=True)
    h = batchnorm_leaky(h, m2, v2, params["g2"], params["be2"])
    h, m3, v3 = conv2d_pallas(h, params["w3"], None, stride=1,
                              apply_act=False, emit_stats=True)
    h = batchnorm_leaky(h, m3, v3, params["g3"], params["be3"])
    # conv4: Cout=1 (padded to 128 lanes inside the kernel); tiny at the tail.
    h = conv2d_pallas(h, params["w4"], params["b4"], stride=1, apply_act=False)
    return jnp.transpose(h, (0, 3, 1, 2))                         # (N,1,Ho,Wo)


def init_params(key, disc_in_channels=3, ndf=64):
    ks = jax.random.split(key, 10)
    cw = lambda k, co, ci: 0.02 * jax.random.normal(k, (co, ci, 4, 4), jnp.float32)
    bn = lambda k, co: 1.0 + 0.02 * jax.random.normal(k, (co,), jnp.float32)
    return {
        "logvar": jnp.float32(0.0),                                # logvar_init
        "w0": cw(ks[0], ndf, disc_in_channels),
        "b0": jnp.zeros((ndf,), jnp.float32),
        "w1": cw(ks[1], ndf * 2, ndf),
        "g1": bn(ks[2], ndf * 2), "be1": jnp.zeros((ndf * 2,), jnp.float32),
        "w2": cw(ks[3], ndf * 4, ndf * 2),
        "g2": bn(ks[4], ndf * 4), "be2": jnp.zeros((ndf * 4,), jnp.float32),
        "w3": cw(ks[5], ndf * 8, ndf * 4),
        "g3": bn(ks[6], ndf * 8), "be3": jnp.zeros((ndf * 8,), jnp.float32),
        "w4": cw(ks[7], 1, ndf * 8),
        "b4": jnp.zeros((1,), jnp.float32),
    }


def hinge_d_loss(logits_real, logits_fake):
    loss_real = jnp.mean(jax.nn.relu(1.0 - logits_real))
    loss_fake = jnp.mean(jax.nn.relu(1.0 + logits_fake))
    return 0.5 * (loss_real + loss_fake)


# ----------------------------------------------------------------------------
# LPIPSWithDiscriminator.forward
# ----------------------------------------------------------------------------
CONFIG = dict(
    disc_start=50, logvar_init=0.0, kl_weight=1.0, pixelloss_weight=1.0,
    disc_num_layers=3, disc_in_channels=3, disc_factor=1.0, disc_weight=1.0,
    # TODO(synk): LPIPS perceptual loss requires a pretrained VGG16; weight set to 0.
    perceptual_weight=0.0,
    disc_conditional=False, disc_loss="hinge",
)


def lpips_with_discriminator_forward(params, inputs, reconstructions,
                                     post_mean, post_logvar,
                                     optimizer_idx, global_step,
                                     last_layer=None, cond=None,
                                     split="train", weights=None):
    cfg = CONFIG
    bsz = inputs.shape[0]
    numel = inputs.size
    logvar = params["logvar"]

    # rec_loss = |x - x_rec| ; nll = rec/exp(logvar) + logvar (elementwise)
    rec_sum = abs_diff_sum_pallas(inputs, reconstructions)
    nll_sum = rec_sum / jnp.exp(logvar) + logvar * numel
    nll_loss = nll_sum / bsz
    if weights is None:
        weighted_nll_loss = nll_loss
    else:
        # optional path; falls back to XLA elementwise
        weighted_nll_loss = jnp.sum(
            weights * (jnp.abs(inputs - reconstructions) / jnp.exp(logvar)
                       + logvar)) / bsz
    rec_loss_mean = rec_sum / numel

    # KL of the diagonal-Gaussian posterior: 0.5 * sum(mu^2 + exp(lv) - 1 - lv)
    kl_loss = kl_sum_pallas(post_mean, post_logvar) / bsz

    disc_factor = adopt_weight(cfg["disc_factor"], global_step,
                               threshold=cfg["disc_start"])

    if optimizer_idx == 0:
        if cond is None:
            assert not cfg["disc_conditional"]
            disc_in = reconstructions
        else:
            assert cfg["disc_conditional"]
            disc_in = jnp.concatenate([reconstructions, cond], axis=1)
        logits_fake = discriminator_forward(params, disc_in)
        g_loss = -jnp.mean(logits_fake)
        # TODO(synk): adaptive d_weight (calculate_adaptive_weight) needs autograd
        # through the generator's last layer, unavailable in this standalone
        # forward; using the module's non-training fallback value 0.0.
        d_weight = jnp.float32(0.0)
        loss = (weighted_nll_loss + cfg["kl_weight"] * kl_loss
                + d_weight * disc_factor * g_loss)
        log = {
            f"{split}/total_loss": loss,
            f"{split}/logvar": logvar,
            f"{split}/kl_loss": kl_loss,
            f"{split}/nll_loss": nll_loss,
            f"{split}/rec_loss": rec_loss_mean,
            f"{split}/d_weight": d_weight,
            f"{split}/disc_factor": jnp.asarray(disc_factor, jnp.float32),
            f"{split}/g_loss": g_loss,
        }
        return loss, log

    if optimizer_idx == 1:
        det = jax.lax.stop_gradient
        if cond is None:
            logits_real = discriminator_forward(params, det(inputs))
            logits_fake = discriminator_forward(params, det(reconstructions))
        else:
            logits_real = discriminator_forward(
                params, jnp.concatenate([det(inputs), cond], axis=1))
            logits_fake = discriminator_forward(
                params, jnp.concatenate([det(reconstructions), cond], axis=1))
        d_loss = disc_factor * hinge_d_loss(logits_real, logits_fake)
        log = {
            f"{split}/disc_loss": d_loss,
            f"{split}/logits_real": jnp.mean(logits_real),
            f"{split}/logits_fake": jnp.mean(logits_fake),
        }
        return d_loss, log

    raise ValueError(f"optimizer_idx must be 0 or 1, got {optimizer_idx}")


# ----------------------------------------------------------------------------
if __name__ == "__main__":
    key = jax.random.PRNGKey(0)
    k_in, k_rec, k_mu, k_lv, k_par = jax.random.split(key, 5)

    # NCHW, 3 channels (disc_in_channels=3); 32x32 so the 5-conv PatchGAN
    # stack stays valid (32 -> 16 -> 8 -> 4 -> 3 -> 2).
    inputs = jax.random.normal(k_in, (2, 3, 32, 32), jnp.float32)
    reconstructions = jax.random.normal(k_rec, (2, 3, 32, 32), jnp.float32)
    post_mean = jax.random.normal(k_mu, (2, 4, 8, 8), jnp.float32)
    post_logvar = 0.1 * jax.random.normal(k_lv, (2, 4, 8, 8), jnp.float32)

    params = init_params(k_par)

    # generator (optimizer_idx=0) step
    loss_g, log_g = lpips_with_discriminator_forward(
        params, inputs, reconstructions, post_mean, post_logvar,
        optimizer_idx=0, global_step=100)
    jax.block_until_ready(loss_g)

    # discriminator (optimizer_idx=1) step
    loss_d, log_d = lpips_with_discriminator_forward(
        params, inputs, reconstructions, post_mean, post_logvar,
        optimizer_idx=1, global_step=100)
    jax.block_until_ready(loss_d)

    print("KERNEL_OK")
</pallas_src>

<mosaic_0001>
module attributes {stable_mosaic.version = 11 : i64} {
  func.func @_abs_diff_sum_kernel(%arg0: i32, %arg1: i32, %arg2: memref<8x512xf32, #tpu.memory_space<vmem>>, %arg3: memref<8x512xf32, #tpu.memory_space<vmem>>, %arg4: memref<8x128xf32, #tpu.memory_space<vmem>>, %arg5: memref<8x512xf32, #tpu.memory_space<vmem>>) attributes {dimension_semantics = [#tpu.dimension_semantics<parallel>, #tpu.dimension_semantics<arbitrary>], iteration_bounds = array<i64: 2, 1>, scalar_prefetch = 0 : i64, scratch_operands = 1 : i64, tpu.core_type = #tpu.core_type<tc>, window_params = [{transform_indices = @transform_0, window_bounds = array<i64: 8, 512>}, {transform_indices = @transform_1, window_bounds = array<i64: 8, 512>}, {transform_indices = @transform_2, window_bounds = array<i64: 8, 128>}]} {
    %c0_i32 = arith.constant 0 : i32
    %0 = arith.cmpi eq, %arg1, %c0_i32 : i32
    %1 = arith.extui %0 : i1 to i32
    %c0_i32_0 = arith.constant 0 : i32
    %2 = arith.cmpi ne, %1, %c0_i32_0 : i32
    scf.if %2 {
      %cst = arith.constant 0.000000e+00 : f32
      %13 = vector.broadcast %cst : f32 to vector<8x512xf32>
      %c0_10 = arith.constant 0 : index
      %c0_11 = arith.constant 0 : index
      %14 = vector.load %arg5[%c0_10, %c0_11] : memref<8x512xf32, #tpu.memory_space<vmem>>, vector<8x512xf32>
      tpu.vector_store %arg5[%c0_10, %c0_11], %13 {strides = array<i32>} : memref<8x512xf32, #tpu.memory_space<vmem>>, vector<8x512xf32>,
    } else {
    }
    %c0 = arith.constant 0 : index
    %c0_1 = arith.constant 0 : index
    %3 = vector.load %arg5[%c0, %c0_1] : memref<8x512xf32, #tpu.memory_space<vmem>>, vector<8x512xf32>
    %c0_2 = arith.constant 0 : index
    %c0_3 = arith.constant 0 : index
    %4 = vector.load %arg2[%c0_2, %c0_3] : memref<8x512xf32, #tpu.memory_space<vmem>>, vector<8x512xf32>
    %c0_4 = arith.constant 0 : index
    %c0_5 = arith.constant 0 : index
    %5 = vector.load %arg3[%c0_4, %c0_5] : memref<8x512xf32, #tpu.memory_space<vmem>>, vector<8x512xf32>
    %6 = arith.subf %4, %5 : vector<8x512xf32>
    %7 = math.absf %6 : vector<8x512xf32>
    %8 = arith.addf %3, %7 : vector<8x512xf32>
    %c0_6 = arith.constant 0 : index
    %c0_7 = arith.constant 0 : index
    %9 = vector.load %arg5[%c0_6, %c0_7] : memref<8x512xf32, #tpu.memory_space<vmem>>, vector<8x512xf32>
    tpu.vector_store %arg5[%c0_6, %c0_7], %8 {strides = array<i32>} : memref<8x512xf32, #tpu.memory_space<vmem>>, vector<8x512xf32>,
    %c0_i32_8 = arith.constant 0 : i32
    %10 = arith.cmpi eq, %arg1, %c0_i32_8 : i32
    %11 = arith.extui %10 : i1 to i32
    %c0_i32_9 = arith.constant 0 : i32
    %12 = arith.cmpi ne, %11, %c0_i32_9 : i32
    scf.if %12 {
      %cst = arith.constant 0.000000e+00 : f32
      %13 = vector.broadcast %cst : f32 to vector<8x128xf32>
      %c0_10 = arith.constant 0 : index
      %c0_11 = arith.constant 0 : index
      %14 = vector.load %arg5[%c0_10, %c0_11] : memref<8x512xf32, #tpu.memory_space<vmem>>, vector<8x512xf32>
      %15 = vector.shape_cast %14 : vector<8x512xf32> to vector<1x8x512xf32>
      %cst_12 = arith.constant dense<0.000000e+00> : vector<1xf32>
      %16 = vector.multi_reduction <add>, %15, %cst_12 [1, 2] : vector<1x8x512xf32> to vector<1xf32>
      %17 = vector.shape_cast %16 : vector<1xf32> to vector<1x1x1xf32>
      %18 = vector.extract %17[0, 0, 0] : f32 from vector<1x1x1xf32>
      %19 = vector.broadcast %18 : f32 to vector<8x128xf32>
      %20 = arith.addf %13, %19 : vector<8x128xf32>
      %c0_13 = arith.constant 0 : index
      %c0_14 = arith.constant 0 : index
      %21 = vector.load %arg4[%c0_13, %c0_14] : memref<8x128xf32, #tpu.memory_space<vmem>>, vector<8x128xf32>
      tpu.vector_store %arg4[%c0_13, %c0_14], %20 {strides = array<i32>} : memref<8x128xf32, #tpu.memory_space<vmem>>, vector<8x128xf32>,
    } else {
    }
    return
  }
  func.func @transform_0(%arg0: i32, %arg1: i32) -> (i32, i32) {
    %c1_i32 = arith.constant 1 : i32
    %0 = arith.muli %arg0, %c1_i32 : i32
    %1 = arith.addi %0, %arg1 : i32
    %c0_i32 = arith.constant 0 : i32
    %c0_i32_0 = arith.constant 0 : i32
    return %1, %c0_i32 : i32, i32
  }
  func.func @transform_1(%arg0: i32, %arg1: i32) -> (i32, i32) {
    %c1_i32 = arith.constant 1 : i32
    %0 = arith.muli %arg0, %c1_i32 : i32
    %1 = arith.addi %0, %arg1 : i32
    %c0_i32 = arith.constant 0 : i32
    %c0_i32_0 = arith.constant 0 : i32
    return %1, %c0_i32 : i32, i32
  }
  func.func @transform_2(%arg0: i32, %arg1: i32) -> (i32, i32) {
    %c0_i32 = arith.constant 0 : i32
    %c0_i32_0 = arith.constant 0 : i32
    return %arg0, %c0_i32 : i32, i32
  }
}

</mosaic_0001>

<bundles_post_ra>
// kernel: tpu_custom_call.1
= control target key start
LH: loop header
LB: loop body
LE: loop exit
PB: predicated region body
PF: predicated region fallthrough
CT: control target
= control target key end

     0   :  { %7 = vsyncpa [#allocation4], 0  ;;  %s869_s0 = inlined_call_operand.hbm [shape: f32[16,512], index: 0, kind: input, shape index: {}]   ;;  %s870_s1 = inlined_call_operand.hbm [shape: f32[16,512], index: 1, kind: input, shape index: {}]   ;;  %s871_s2 = inlined_call_operand.hbm [shape: f32[16,128], index: 2, kind: output, shape index: {}]  }
   0x1   :  { %9 = vsyncpa [#allocation4 + $0x1], 0 }
   0x2   :  { %10 = vsyncpa [#allocation7], 0 }
   0x3   :  { %12 = vsyncpa [#allocation7 + $0x1], 0 }
   0x4   :  { %13 = vsyncpa [#allocation5], 0 }
   0x5   :  { %15 = vsyncpa [#allocation5 + $0x1], 0  ;;  %s648_s9 = smov 0   ;;  %s650_s10 = smov 0  }
   0x6   :  { %s652_s11 = smov 0   ;;  %s654_s12 = smov 0  }
   0x7   :  { %s656_s13 = smov 0   ;;  %s658_s14 = smov 0  }
   0x8 LB: > { %s393_s15 = sadd.s32 4294967295, %s628_s14   ;;  %s394_s16 = sadd.s32 4294967294, %s628_s14   ;;  %s628_s14 = sphi %s658_s14, %s21_s14   ;;  %s624_s13 = sphi %s656_s13, %s891_s13   ;;  %s620_s12 = sphi %s654_s12, %s890_s12   ;;  %s616_s11 = sphi %s652_s11, %s889_s11   ;;  %s612_s10 = sphi %s650_s10, %s888_s10   ;;  %s608_s9 = sphi %s648_s9, %s887_s9  }
   0x9   : > { %s33_s17 = sadd.s32 1, %s624_s13  ;;  %s42_s18 = sadd.s32 1, %s616_s11 }
   0xa   : > { %p35_p0 = scmp.ge.s32.totalorder %s33_s17, 2  ;;  %p49_p1 = scmp.ne.s32.totalorder %s616_s11, %s612_s10 }
   0xb   : > { %p50_p2 = scmp.eq.s32.totalorder %s628_s14, 0  ;;  %p55_p3 = scmp.ne.s32.totalorder %s612_s10, %s608_s9 }
   0xc   : > { %s893_s17 = smov (%p35_p0, %s33_s17), 0  ;;  %p56_p5 = scmp.eq.s32.totalorder %s393_s15, 0 }
   0xd   : > { %p689_p4 = por %p50_p2, %p49_p1  ;;  %s39_s20 = ssub.s32 %s624_s13, %s893_s17 }
   0xe   : > { %p107_p6 = scmp.eq.s32.totalorder %s393_s15, 1  ;;  %p40_p7 = scmp.eq.s32.totalorder %s39_s20, 0 }
   0xf   : > { %p695_p8 = por %p56_p5, %p55_p3  ;;  %p113_p10 = scmp.eq.s32.totalorder %s394_s16, 1 }
  0x10   : > { %p699_p9 = por %p107_p6, %p49_p1  ;;  %p432_p13 = scmp.lt.s32.totalorder %s628_s14, 2 }
  0x11   : > { %s875_s21 = scalar_select %p695_p8, 1, 0 }
  0x12   : > { %s876_s22 = scalar_select %p699_p9, 1, 0 }
  0x13   : > { %s704_s23 = scalar_select %p40_p7, %s616_s11, %s42_s18  }
  0x14   : > { %p706_p11 = por %p113_p10, %p55_p3  ;;  %s713_s25 = sand.u32 1, %s616_s11  }
  0x15   : > { %s397_s26 = sshll.u32 %s713_s25, 5  ;;  %s411_s27 = sshll.u32 %s624_s13, 9 }
  0x16   : > { %s877_s24 = scalar_select %p706_p11, 1, 0 }
  0x17   : > { %s722_s30 = scalar_lea.hbm %s869_s0, %s411_s27  ;;  %s137_s3 = scalar_lea.vmem [#allocation3], %s397_s26 }
  0x18   : > { %s146_s4 = sshll.u32 %s137_s3, 4  ;;  %p730_p0 = pnand %p432_p13, %p689_p4  ;;  %s726_s4 = int_to_ptr.vmem [resolvable:$true] %s146_s4 }
  0x19   : > { %s134_s6 = scalar_lea.sflag [#allocation4], %s713_s25  ;;  %s482_s7 = scalar_lea.hbm %s722_s30, 512 }
  0x1a   : > { %p483_p3 = scmp.ne.s32.totalorder %s722_s30, %s482_s7  ;;  %p484_p5 = pneg %p730_p0 }
  0x1b   : > { %s487_s16 = scalar_lea.hbm %s869_s0, 1024  ;;  %p488_p4 = scmp.lt.u32.totalorder %s722_s30, %s869_s0 }
  0x1c   : > { %p485_p6 = pnand %p484_p5, %p483_p3  ;;  %p489_p10 = scmp.lt.u32.totalorder %s487_s16, %s482_s7 }
  0x1d   : > { %p491_p12 = scmp.lt.u32.totalorder %s482_s7, %s722_s30 }
  0x1e   : > { %p486_p7 = pneg %p485_p6  ;;  %p490_p13 = por %p489_p10, %p488_p4 }
  0x20   : > { %p492_p1 = por %p491_p12, %p490_p13 }
  0x22   : > { %p493_p2 = pnand %p492_p1, %p486_p7 }
  0x24   : > { %496 = shalt.err (!%p493_p2)
}
  0x25   : > { %s497_s20 = scalar_lea.vmem %s726_s4, 512  ;;  %s630_s28 = smov [#allocation3]  }
  0x26   : > { %p498_p3 = scmp.ne.s32.totalorder %s726_s4, %s497_s20  ;;  %s502_s29 = sshll.u32 %s630_s28, 4  ;;  %s503_s29 = int_to_ptr.vmem [resolvable:$false] %s502_s29 }
  0x27   : > { %s504_s3 = scalar_lea.vmem %s503_s29, 1024  ;;  %p505_p9 = scmp.lt.s32.totalorder %s726_s4, %s503_s29 }
  0x28   : > { %p500_p6 = pnand %p498_p3, %p484_p5  ;;  %p506_p4 = scmp.lt.s32.totalorder %s504_s3, %s497_s20 }
  0x2a   : > { %p501_p11 = pneg %p500_p6  ;;  %p507_p10 = por %p506_p4, %p505_p9 }
  0x2c   : > { %p508_p12 = pnand %p507_p10, %p501_p11 }
  0x2e   : > { %511 = shalt.err (!%p508_p12)
}
  0x2f   : > { %424 = dma.hbm_to_vmem [thread:$0]  (!%p730_p0), %s722_s30, 512, %s726_s4, %s134_s6  }
  0x30   : > { %p879_p1 = scmp.lt.s32.totalorder %s628_s14, 3  ;;  %p880_p2 = scmp.ge.s32.totalorder %s628_s14, 1 }
  0x31   : > { %s775_s16 = scalar_lea.hbm %s870_s1, %s411_s27  ;;  %s157_s18 = scalar_lea.vmem [#allocation6], %s397_s26 }
  0x32   : > { %p766_p7 = pnand %p880_p2, %p879_p1  ;;  %s166_s19 = sshll.u32 %s157_s18, 4  ;;  %s167_s19 = int_to_ptr.vmem [resolvable:$true] %s166_s19 }
  0x33   : > { %s154_s30 = scalar_lea.sflag [#allocation7], %s713_s25  ;;  %s512_s4 = scalar_lea.hbm %s775_s16, 512 }
  0x34   : > { %s881_s7 = scalar_select %p766_p7, 1, 0 }
  0x35   : > { %p513_p9 = scmp.ne.s32.totalorder %s775_s16, %s512_s4  ;;  %s517_s27 = scalar_lea.hbm %s870_s1, 1024 }
  0x36   : > { %p518_p3 = scmp.lt.u32.totalorder %s775_s16, %s870_s1  ;;  %p519_p6 = scmp.lt.u32.totalorder %s517_s27, %s512_s4 }
  0x37   : > { %p515_p11 = pnand %p513_p9, %p484_p5  ;;  %p521_p10 = scmp.lt.u32.totalorder %s512_s4, %s775_s16 }
  0x38   : > { %p520_p4 = por %p519_p6, %p518_p3 }
  0x39   : > { %p516_p13 = pneg %p515_p11 }
  0x3a   : > { %p522_p12 = por %p521_p10, %p520_p4 }
  0x3c   : > { %p523_p1 = pnand %p522_p12, %p516_p13 }
  0x3e   : > { %526 = shalt.err (!%p523_p1)
}
  0x3f   : > { %s527_s25 = scalar_lea.vmem %s167_s19, 512  ;;  %s631_s26 = smov [#allocation6]  }
  0x40   : > { %p528_p2 = scmp.ne.s32.totalorder %s167_s19, %s527_s25  ;;  %s532_s3 = sshll.u32 %s631_s26, 4  ;;  %s533_s3 = int_to_ptr.vmem [resolvable:$false] %s532_s3 }
  0x41   : > { %s534_s8 = scalar_lea.vmem %s533_s3, 1024  ;;  %p535_p8 = scmp.lt.s32.totalorder %s167_s19, %s533_s3 }
  0x42   : > { %p530_p9 = pnand %p528_p2, %p484_p5  ;;  %p536_p7 = scmp.lt.s32.totalorder %s534_s8, %s527_s25 }
  0x44   : > { %p531_p11 = pneg %p530_p9  ;;  %p537_p3 = por %p536_p7, %p535_p8 }
  0x46   : > { %p538_p6 = pnand %p537_p3, %p531_p11 }
  0x48   : > { %541 = shalt.err (!%p538_p6)
}
  0x49   : > { %427 = dma.hbm_to_vmem [thread:$0]  (!%p730_p0), %s775_s16, 512, %s167_s19, %s154_s30  }
  0x4a   : > { %p882_p13 = scmp.ne.s32.totalorder %s881_s7, 0 }
  0x4b   : > { %s802_s15 = sand.u32 (!%p882_p13), 1, %s612_s10   ;;  %p883_p5 = scmp.ne.s32.totalorder (!%p882_p13), %s875_s21, 0 }
  0x4c   : > { %175 = sbr.rel (%p882_p13) target bundleno = 318 (0x13e), region = 28  ;;  %s404_s18 = sshll.u32 (!%p882_p13), %s802_s15, 5 }
  0x4d   : > { %s178_s4 = scalar_lea.sflag (!%p882_p13), [#allocation4], %s802_s15  ;;  %s181_s6 = scalar_lea.vmem (!%p882_p13), [#allocation3], %s404_s18 }
  0x53   : > { %595 = dma.done.wait (%p883_p5), %s178_s4, 512  }
  0x54   : > { %597 = vsyncadd (%p883_p5), %s178_s4, 4294966784  ;;  %s187_s5 = scalar_lea.sflag [#allocation7], %s802_s15  ;;  %s190_s16 = scalar_lea.vmem [#allocation6], %s404_s18 }
  0x55   : > { %599 = dma.done.wait (%p883_p5), %s187_s5, 512  }
  0x56   : > { %601 = vsyncadd (%p883_p5), %s187_s5, 4294966784  ;;  %v230_v0 = vld [vmem:[%s181_s6] sm:$0xff]  ;;  %v231_v1 = vld [vmem:[%s181_s6 + $0x8] sm:$0xff]  ;;  %s406_s21 = sshll.u32 %s802_s15, 3  ;;  %s408_s30 = sshll.u32 %s620_s12, 7 }
  0x57   : > { %v232_v2 = vld [vmem:[%s181_s6 + $0x10] sm:$0xff]  ;;  %v233_v3 = vld [vmem:[%s181_s6 + $0x18] sm:$0xff]  ;;  %v234_v4 = vld [vmem:[%s190_s16] sm:$0xff]  ;;  %s215_s7 = scalar_lea.vmem [#allocation8], %s406_s21  ;;  %s822_s29 = scalar_lea.hbm %s871_s2, %s408_s30 }
  0x58   : > { %v235_v5 = vld [vmem:[%s190_s16 + $0x8] sm:$0xff]  ;;  %v236_v6 = vld [vmem:[%s190_s16 + $0x10] sm:$0xff]  ;;  %v237_v7 = vld [vmem:[%s190_s16 + $0x18] sm:$0xff]  ;;  %v238_v8 = vsub.f32 %v230_v0, %v234_v4  ;;  %s290_s19 = sshll.u32 %s215_s7, 4  ;;  %s277_s25 = scalar_lea.sflag [#allocation5], %s802_s15  ;;  %s817_s19 = int_to_ptr.vmem [resolvable:$true] %s290_s19 }
  0x59   : > { %v239_v9 = vsub.f32 %v231_v1, %v235_v5  ;;  %v240_v10 = vsub.f32 %v232_v2, %v236_v6  ;;  %v241_v11 = vsub.f32 %v233_v3, %v237_v7  ;;  %s542_s26 = scalar_lea.vmem %s817_s19, 128  ;;  %p884_p0 = scmp.ne.s32.totalorder %s876_s22, 0 }
  0x5a   : > { %v242_v12 = vand.u32 2147483647, %v238_v8  ;;  %p543_p8 = scmp.ne.s32.totalorder %s817_s19, %s542_s26  ;;  %s632_s12 = smov [#allocation8]  }
  0x5b   : > { %v243_v13 = vand.u32 2147483647, %v239_v9  ;;  %v244_v14 = vand.u32 2147483647, %v240_v10  ;;  %v245_v15 = vand.u32 2147483647, %v241_v11 }
  0x5c   : > { %p544_p7 = pnand %p543_p8, %p884_p0  ;;  %s546_s3 = sshll.u32 %s632_s12, 4  ;;  %s547_s3 = int_to_ptr.vmem [resolvable:$false] %s546_s3 }
  0x5d   : > { %v261_v16 = vadd.f32 %v243_v13, %v242_v12  ;;  %s548_s8 = scalar_lea.vmem %s547_s3, 256  ;;  %p549_p10 = scmp.lt.s32.totalorder %s817_s19, %s547_s3 }
  0x5e   : > { %p545_p4 = pneg %p544_p7  ;;  %p550_p12 = scmp.lt.s32.totalorder %s548_s8, %s542_s26 }
  0x5f   : > { %v262_v17 = vadd.f32 %v261_v16, %v244_v14 }
  0x60   : > { %p551_p1 = por %p550_p12, %p549_p10 }
  0x61   : > { %v263_v18 = vadd.f32 %v262_v17, %v245_v15 }
  0x62   : > { %p552_p2 = pnand %p551_p1, %p545_p4 }
  0x63   : > { %264 = vadd.xlane.f32.xlu0 %v263_v18 }
  0xf0   : > { %v265_v19 = vpop.xlane.xlu0 %264 }
  0xf1   : > { %v266_v20 = vrot.slane %v265_v19, 4 }
  0xf3   : > { %v267_v21 = vadd.f32 %v266_v20, %v265_v19 }
  0xf5   : > { %v268_v22 = vrot.slane %v267_v21, 2 }
  0xf7   : > { %v269_v23 = vadd.f32 %v268_v22, %v267_v21 }
  0xf9   : > { %v270_v24 = vrot.slane %v269_v23, 1 }
  0xfb   : > { %v271_v25 = vadd.f32 %v270_v24, %v269_v23 }
  0xfd   : > { %413 = vpush %v271_v25 }
 0x12e   : > { %s414_s20 = spop %413 }
 0x12f   : > { %v273_v26 = vstv %s414_s20 }
 0x130   : > { %275 = vst [vmem:[%s215_s7] sm:$0xff] %v273_v26 }
 0x131   : > { %555 = shalt.err (!%p552_p2)
}
 0x132   : > { %s556_s15 = scalar_lea.hbm %s822_s29, 128  ;;  %s560_s6 = scalar_lea.hbm %s871_s2, 256 }
 0x133   : > { %p557_p9 = scmp.ne.s32.totalorder %s822_s29, %s556_s15  ;;  %p561_p6 = scmp.lt.u32.totalorder %s822_s29, %s871_s2 }
 0x134   : > { %p562_p13 = scmp.lt.u32.totalorder %s560_s6, %s556_s15  ;;  %p564_p8 = scmp.lt.u32.totalorder %s556_s15, %s822_s29 }
 0x135   : > { %p558_p11 = pnand %p557_p9, %p884_p0 }
 0x136   : > { %p563_p5 = por %p562_p13, %p561_p6 }
 0x137   : > { %p559_p3 = pneg %p558_p11 }
 0x138   : > { %p565_p7 = por %p564_p8, %p563_p5 }
 0x13a   : > { %p566_p4 = pnand %p565_p7, %p559_p3 }
 0x13c   : > { %569 = shalt.err (!%p566_p4)
}
 0x13d   : > { %419 = dma.vmem_to_hbm [thread:$0]  (%p884_p0), %s817_s19, 128, %s822_s29, %s277_s25  }
 0x13e PF: > { %s302_s21 = sand.u32 1, %s608_s9   ;;  %p885_p10 = scmp.ne.s32.totalorder %s877_s24, 0 }
 0x13f   : > { %p886_p12 = scmp.ge.s32.totalorder %s628_s14, 2  ;;  %s303_s7 = scalar_lea.sflag [#allocation5], %s302_s21 }
 0x141   : > { %p429_p1 = pnand %p886_p12, %p885_p10 }
 0x143   : > { %603 = dma.done.wait (!%p429_p1), %s303_s7, 128  }
 0x144   : > { %605 = vsyncadd (!%p429_p1), %s303_s7, 4294967168  ;;  %s21_s14 = sadd.s32 1, %s628_s14   ;;  %s887_s9 = smov %s612_s10 }
 0x145   : > { %p18_p2 = scmp.ge.s32.totalorder %s21_s14, 4   ;;  %s888_s10 = smov %s616_s11 }
 0x146   : > { %s889_s11 = smov %s704_s23  ;;  %s890_s12 = smov %s624_s13 }
 0x147   : > { %s891_s13 = smov %s893_s17  ;;  %20 = sbr.rel (!%p18_p2) target bundleno = 8 (0x8), region = 94 }
 0x14e   :  { %308 = vsyncpa [#allocation4], 1 }
 0x14f   :  { %310 = vsyncpa [#allocation4 + $0x1], 1 }
 0x150   :  { %311 = vsyncpa [#allocation7], 1 }
 0x151   :  { %313 = vsyncpa [#allocation7 + $0x1], 1 }
 0x152   :  { %314 = vsyncpa [#allocation5], 1 }
 0x153   :  { %316 = vsyncpa [#allocation5 + $0x1], 1 }

</bundles_post_ra>
